<compile_context>
chip_gen: v6e
topology: v6e:2x2x1
jax: 0.10.0
libtpu: 0.0.40
codegen_flags: <defaults>
</compile_context>

<pallas_src>
import functools

import jax
import jax.numpy as jnp
from jax.experimental import pallas as pl
from jax.experimental.pallas import tpu as pltpu


def _round_up(x, m):
    return ((x + m - 1) // m) * m


def _block_diag(w, p):
    """(a, b) -> (p*a, p*b) block-diagonal matrix holding p copies of w."""
    if p == 1:
        return w
    a, b = w.shape
    eye = jnp.eye(p, dtype=w.dtype)
    return (eye[:, None, :, None] * w[None, :, None, :]).reshape(p * a, p * b)


# ----------------------------- kernels ------------------------------------ #

def _mlp_tanh_kernel(x_ref, w1_ref, b1_ref, w2_ref, b2_ref, o_ref):
    """o = tanh( tanh(x @ W1bd + b1) @ W2bd + b2 ) for one batch-row tile.

    x_ref  : (bm, dp)   VMEM  packed batch tile (p rows folded into dp lanes)
    w1_ref : (dp, ph)   VMEM  block-diagonal hidden weights (grid-resident)
    b1_ref : (1, ph)    VMEM  tiled hidden bias
    w2_ref : (ph, p)    VMEM  block-diagonal ranker weights
    b2_ref : (1, 1)     SMEM  ranker bias (scalar)
    o_ref  : (bm, p)    VMEM  packed scores
    """
    h = jnp.tanh(
        jnp.dot(x_ref[...], w1_ref[...], preferred_element_type=jnp.float32)
        + b1_ref[...]
    )
    s = jnp.dot(h, w2_ref[...], preferred_element_type=jnp.float32) + b2_ref[0, 0]
    o_ref[...] = jnp.tanh(s).astype(o_ref.dtype)


def _ranker_tanh_kernel(x_ref, w_ref, b_ref, o_ref):
    """num_hidden == 0 path: o = tanh(x @ Wbd + b)."""
    s = jnp.dot(x_ref[...], w_ref[...], preferred_element_type=jnp.float32) + b_ref[0, 0]
    o_ref[...] = jnp.tanh(s).astype(o_ref.dtype)


# ----------------------------- wrapper ------------------------------------ #

def _choose_block_rows(n_rows, row_bytes, block_m):
    """Pick the per-grid-step row-tile size."""
    if n_rows <= 8:
        return max(n_rows, 1)  # one full block; no masking, no (8,128) issue
    # ~12 MiB budget covers the double-buffered x tile plus in-kernel
    # intermediates with headroom under the 16/32/32 MiB scoped-VMEM defaults
    # on v5e/v6e/v7x (no explicit vmem_limit_bytes needed).
    vmem_cap = max(8, ((12 << 20) // row_bytes) // 8 * 8)
    # Keep >= 2 tiles on large batches so the "parallel" grid axis can be
    # sharded across v7x's two TensorCores.
    two_tiles = _round_up(pl.cdiv(n_rows, 2), 8)
    return max(8, min(block_m, vmem_cap, two_tiles))


def _run_scores(x, params, num_hidden, block_m):
    """Shared ranker network over one feature matrix x: (N, D) -> (N, 1)."""
    n, d = x.shape
    if n == 0:
        return jnp.zeros((0, 1), x.dtype)

    # Row packing: fold p batch rows into one 128-lane feature row via a free
    # row-major reshape; block-diagonal weights keep both layers dense MXU
    # matmuls.  Falls back to p=1 when D doesn't divide 128 or N % p != 0.
    p = 128 // d if (d < 128 and 128 % d == 0 and n % (128 // d) == 0) else 1
    n_rows = n // p
    dp = d * p
    x_packed = x.reshape(n_rows, dp) if p > 1 else x

    smem_spec = pl.BlockSpec(memory_space=pltpu.MemorySpace.SMEM)
    compiler_params = pltpu.CompilerParams(dimension_semantics=("parallel",))

    if num_hidden > 0:
        w1, b1, w2, b2 = params
        ph = num_hidden * p
        w1_bd = _block_diag(w1, p)                             # (dp, ph)
        b1_t = jnp.tile(b1.reshape(1, num_hidden), (1, p))     # (1, ph)
        w2_bd = _block_diag(w2.reshape(num_hidden, 1), p)      # (ph, p)
        b2_s = b2.reshape(1, 1)

        row_bytes = 4 * (dp + ph + p)
        bm = _choose_block_rows(n_rows, row_bytes, block_m)
        num_tiles = pl.cdiv(n_rows, bm)

        out = pl.pallas_call(
            _mlp_tanh_kernel,
            out_shape=jax.ShapeDtypeStruct((n_rows, p), x.dtype),
            grid_spec=pltpu.PrefetchScalarGridSpec(
                num_scalar_prefetch=0,
                grid=(num_tiles,),
                in_specs=[
                    pl.BlockSpec((bm, dp), lambda i: (i, 0)),   # x tile
                    pl.BlockSpec((dp, ph), lambda i: (0, 0)),   # W1 block-diag
                    pl.BlockSpec((1, ph), lambda i: (0, 0)),    # b1 tiled
                    pl.BlockSpec((ph, p), lambda i: (0, 0)),    # w2 block-diag
                    smem_spec,                                  # b2 scalar
                ],
                out_specs=pl.BlockSpec((bm, p), lambda i: (i, 0)),
            ),
            compiler_params=compiler_params,
        )(x_packed, w1_bd, b1_t, w2_bd, b2_s)
    else:
        w, b = params
        w_bd = _block_diag(w.reshape(d, 1), p)                  # (dp, p)
        b_s = b.reshape(1, 1)

        row_bytes = 4 * (dp + 2 * p)
        bm = _choose_block_rows(n_rows, row_bytes, block_m)
        num_tiles = pl.cdiv(n_rows, bm)

        out = pl.pallas_call(
            _ranker_tanh_kernel,
            out_shape=jax.ShapeDtypeStruct((n_rows, p), x.dtype),
            grid_spec=pltpu.PrefetchScalarGridSpec(
                num_scalar_prefetch=0,
                grid=(num_tiles,),
                in_specs=[
                    pl.BlockSpec((bm, dp), lambda i: (i, 0)),   # x tile
                    pl.BlockSpec((dp, p), lambda i: (0, 0)),    # w block-diag
                    smem_spec,                                  # b scalar
                ],
                out_specs=pl.BlockSpec((bm, p), lambda i: (i, 0)),
            ),
            compiler_params=compiler_params,
        )(x_packed, w_bd, b_s)

    # (n_rows, p) packed scores -> (N, 1).  Row-major, so this is a free
    # contiguous reshape (no HBM copy).
    return out.reshape(n, 1)


@functools.partial(jax.jit, static_argnames=("num_hidden", "block_m"))
def simple_tc_model_dnn_forward(D_tre, D_unt, params, num_hidden, block_m=8192):
    """Returns (h_tre_rnkscore, h_unt_rnkscore), each of shape (N_*, 1).

    Two independent launches: no concatenate / pad of the inputs (each of
    those would cost a full extra HBM round trip on a memory-bound kernel).
    The shared ranker weights are tiny, so streaming them twice is free.
    """
    return (
        _run_scores(D_tre, params, num_hidden, block_m),
        _run_scores(D_unt, params, num_hidden, block_m),
    )


# ----------------------- deterministic parameter init --------------------- #

def init_params(key, input_dim, num_hidden, dtype=jnp.float32):
    """Mimic PyTorch nn.Linear default init (uniform +/- 1/sqrt(fan_in))."""
    if num_hidden > 0:
        k1, k2, k3, k4 = jax.random.split(key, 4)
        bound1 = 1.0 / jnp.sqrt(input_dim)
        bound2 = 1.0 / jnp.sqrt(num_hidden)
        w1 = jax.random.uniform(k1, (input_dim, num_hidden), dtype, -bound1, bound1)
        b1 = jax.random.uniform(k2, (1, num_hidden), dtype, -bound1, bound1)
        w2 = jax.random.uniform(k3, (num_hidden, 1), dtype, -bound2, bound2)
        b2 = jax.random.uniform(k4, (1, 1), dtype, -bound2, bound2)
        return (w1, b1, w2, b2)
    else:
        k1, k2 = jax.random.split(key, 2)
        bound = 1.0 / jnp.sqrt(input_dim)
        w2 = jax.random.uniform(k1, (input_dim, 1), dtype, -bound, bound)
        b2 = jax.random.uniform(k2, (1, 1), dtype, -bound, bound)
        return (w2, b2)


# ----------------------------- reference ---------------------------------- #

def _reference_forward(D_tre, D_unt, params, num_hidden):
    def run(x):
        if num_hidden > 0:
            w1, b1, w2, b2 = params
            h = jnp.tanh(x @ w1 + b1)
            return jnp.tanh(h @ w2 + b2)
        else:
            w2, b2 = params
            return jnp.tanh(x @ w2 + b2)
    return run(D_tre), run(D_unt)


# ------------------------------- main -------------------------------------- #

if __name__ == "__main__":
    input_dim = 32
    num_hidden = 32

    key = jax.random.PRNGKey(0)
    k_tre, k_unt, k_par = jax.random.split(key, 3)

    # batch_tre=8 exercises the packed path (4 rows folded into 128 lanes);
    # batch_unt=10 exercises the unpacked path with a masked partial last tile.
    D_tre = jax.random.normal(k_tre, (8, input_dim), jnp.float32)
    D_unt = jax.random.normal(k_unt, (10, input_dim), jnp.float32)

    # --- path with a hidden layer ---
    params = init_params(k_par, input_dim, num_hidden)
    h_tre, h_unt = simple_tc_model_dnn_forward(D_tre, D_unt, params, num_hidden)
    jax.block_until_ready((h_tre, h_unt))
    r_tre, r_unt = _reference_forward(D_tre, D_unt, params, num_hidden)
    assert h_tre.shape == (8, 1) and h_unt.shape == (10, 1)
    assert jnp.allclose(h_tre, r_tre, atol=1e-5, rtol=1e-5)
    assert jnp.allclose(h_unt, r_unt, atol=1e-5, rtol=1e-5)

    # --- num_hidden == 0 path (ranker only) ---
    params0 = init_params(k_par, input_dim, 0)
    h0_tre, h0_unt = simple_tc_model_dnn_forward(D_tre, D_unt, params0, 0)
    jax.block_until_ready((h0_tre, h0_unt))
    r0_tre, r0_unt = _reference_forward(D_tre, D_unt, params0, 0)
    assert h0_tre.shape == (8, 1) and h0_unt.shape == (10, 1)
    assert jnp.allclose(h0_tre, r0_tre, atol=1e-5, rtol=1e-5)
    assert jnp.allclose(h0_unt, r0_unt, atol=1e-5, rtol=1e-5)

    print("KERNEL_OK")
</pallas_src>

<mosaic_0001>
module attributes {stable_mosaic.version = 11 : i64} {
  func.func @_mlp_tanh_kernel(%arg0: i32, %arg1: memref<2x128xf32, #tpu.memory_space<vmem>>, %arg2: memref<128x128xf32, #tpu.memory_space<vmem>>, %arg3: memref<1x128xf32, #tpu.memory_space<vmem>>, %arg4: memref<128x4xf32, #tpu.memory_space<vmem>>, %arg5: memref<1x1xf32, #tpu.memory_space<smem>>, %arg6: memref<2x4xf32, #tpu.memory_space<vmem>>) attributes {dimension_semantics = [#tpu.dimension_semantics<parallel>], iteration_bounds = array<i64: 1>, scalar_prefetch = 0 : i64, scratch_operands = 0 : i64, tpu.core_type = #tpu.core_type<tc>, window_params = [{transform_indices = @transform_0, window_bounds = array<i64: 2, 128>}, {pipeline_mode = #tpu.pipeline_mode<synchronous>, transform_indices = @transform_1, window_bounds = array<i64: 128, 128>}, {pipeline_mode = #tpu.pipeline_mode<synchronous>, transform_indices = @transform_2, window_bounds = array<i64: 1, 128>}, {pipeline_mode = #tpu.pipeline_mode<synchronous>, transform_indices = @transform_3, window_bounds = array<i64: 128, 4>}, {transform_indices = @transform_4, window_bounds = array<i64: 1, 1>}, {transform_indices = @transform_5, window_bounds = array<i64: 2, 4>}]} {
    %c0 = arith.constant 0 : index
    %c0_0 = arith.constant 0 : index
    %0 = vector.load %arg1[%c0, %c0_0] : memref<2x128xf32, #tpu.memory_space<vmem>>, vector<2x128xf32>
    %c0_1 = arith.constant 0 : index
    %c0_2 = arith.constant 0 : index
    %1 = vector.load %arg2[%c0_1, %c0_2] : memref<128x128xf32, #tpu.memory_space<vmem>>, vector<128x128xf32>
    %cst = arith.constant dense<0.000000e+00> : vector<2x128xf32>
    %2 = tpu.matmul %0, %1, %cst {dimension_numbers = #tpu.dot_dimension_numbers<[1], [0], [0], [1], [0, 0, 1, 1], [], []>} : vector<2x128xf32>, vector<128x128xf32>, vector<2x128xf32> -> vector<2x128xf32>
    %c0_3 = arith.constant 0 : index
    %c0_4 = arith.constant 0 : index
    %3 = vector.load %arg3[%c0_3, %c0_4] : memref<1x128xf32, #tpu.memory_space<vmem>>, vector<1x128xf32>
    %4 = vector.broadcast %3 : vector<1x128xf32> to vector<2x128xf32>
    %5 = arith.addf %2, %4 : vector<2x128xf32>
    %6 = math.tanh %5 : vector<2x128xf32>
    %c0_5 = arith.constant 0 : index
    %c0_6 = arith.constant 0 : index
    %7 = vector.load %arg4[%c0_5, %c0_6] : memref<128x4xf32, #tpu.memory_space<vmem>>, vector<128x4xf32>
    %cst_7 = arith.constant dense<0.000000e+00> : vector<2x4xf32>
    %8 = tpu.matmul %6, %7, %cst_7 {dimension_numbers = #tpu.dot_dimension_numbers<[1], [0], [0], [1], [0, 0, 1, 1], [], []>} : vector<2x128xf32>, vector<128x4xf32>, vector<2x4xf32> -> vector<2x4xf32>
    %c0_8 = arith.constant 0 : index
    %c0_9 = arith.constant 0 : index
    %9 = memref.load %arg5[%c0_8, %c0_9] : memref<1x1xf32, #tpu.memory_space<smem>>
    %10 = vector.broadcast %9 : f32 to vector<2x4xf32>
    %11 = arith.addf %8, %10 : vector<2x4xf32>
    %12 = math.tanh %11 : vector<2x4xf32>
    %c0_10 = arith.constant 0 : index
    %c0_11 = arith.constant 0 : index
    %13 = vector.load %arg6[%c0_10, %c0_11] : memref<2x4xf32, #tpu.memory_space<vmem>>, vector<2x4xf32>
    tpu.vector_store %arg6[%c0_10, %c0_11], %12 {strides = array<i32>} : memref<2x4xf32, #tpu.memory_space<vmem>>, vector<2x4xf32>,
    return
  }
  func.func @transform_0(%arg0: i32) -> (i32, i32) {
    %c0_i32 = arith.constant 0 : i32
    %c0_i32_0 = arith.constant 0 : i32
    return %arg0, %c0_i32 : i32, i32
  }
  func.func @transform_1(%arg0: i32) -> (i32, i32) {
    %c0_i32 = arith.constant 0 : i32
    %c0_i32_0 = arith.constant 0 : i32
    %c0_i32_1 = arith.constant 0 : i32
    return %c0_i32, %c0_i32_0 : i32, i32
  }
  func.func @transform_2(%arg0: i32) -> (i32, i32) {
    %c0_i32 = arith.constant 0 : i32
    %c0_i32_0 = arith.constant 0 : i32
    %c0_i32_1 = arith.constant 0 : i32
    return %c0_i32, %c0_i32_0 : i32, i32
  }
  func.func @transform_3(%arg0: i32) -> (i32, i32) {
    %c0_i32 = arith.constant 0 : i32
    %c0_i32_0 = arith.constant 0 : i32
    %c0_i32_1 = arith.constant 0 : i32
    return %c0_i32, %c0_i32_0 : i32, i32
  }
  func.func @transform_4(%arg0: i32) -> (i32, i32) {
    %c0_i32 = arith.constant 0 : i32
    %c0_i32_0 = arith.constant 0 : i32
    %c0_i32_1 = arith.constant 0 : i32
    return %c0_i32, %c0_i32_0 : i32, i32
  }
  func.func @transform_5(%arg0: i32) -> (i32, i32) {
    %c0_i32 = arith.constant 0 : i32
    %c0_i32_0 = arith.constant 0 : i32
    return %arg0, %c0_i32 : i32, i32
  }
}

module attributes {stable_mosaic.version = 11 : i64} {
  func.func @_mlp_tanh_kernel(%arg0: i32, %arg1: memref<8x32xf32, #tpu.memory_space<vmem>>, %arg2: memref<32x32xf32, #tpu.memory_space<vmem>>, %arg3: memref<1x32xf32, #tpu.memory_space<vmem>>, %arg4: memref<32x1xf32, #tpu.memory_space<vmem>>, %arg5: memref<1x1xf32, #tpu.memory_space<smem>>, %arg6: memref<8x1xf32, #tpu.memory_space<vmem>>) attributes {dimension_semantics = [#tpu.dimension_semantics<parallel>], iteration_bounds = array<i64: 2>, scalar_prefetch = 0 : i64, scratch_operands = 0 : i64, tpu.core_type = #tpu.core_type<tc>, window_params = [{transform_indices = @transform_0, window_bounds = array<i64: 8, 32>}, {pipeline_mode = #tpu.pipeline_mode<synchronous>, transform_indices = @transform_1, window_bounds = array<i64: 32, 32>}, {pipeline_mode = #tpu.pipeline_mode<synchronous>, transform_indices = @transform_2, window_bounds = array<i64: 1, 32>}, {pipeline_mode = #tpu.pipeline_mode<synchronous>, transform_indices = @transform_3, window_bounds = array<i64: 32, 1>}, {transform_indices = @transform_4, window_bounds = array<i64: 1, 1>}, {transform_indices = @transform_5, window_bounds = array<i64: 8, 1>}]} {
    %c0 = arith.constant 0 : index
    %c0_0 = arith.constant 0 : index
    %0 = vector.load %arg1[%c0, %c0_0] : memref<8x32xf32, #tpu.memory_space<vmem>>, vector<8x32xf32>
    %c0_1 = arith.constant 0 : index
    %c0_2 = arith.constant 0 : index
    %1 = vector.load %arg2[%c0_1, %c0_2] : memref<32x32xf32, #tpu.memory_space<vmem>>, vector<32x32xf32>
    %cst = arith.constant dense<0.000000e+00> : vector<8x32xf32>
    %2 = tpu.matmul %0, %1, %cst {dimension_numbers = #tpu.dot_dimension_numbers<[1], [0], [0], [1], [0, 0, 1, 1], [], []>} : vector<8x32xf32>, vector<32x32xf32>, vector<8x32xf32> -> vector<8x32xf32>
    %c0_3 = arith.constant 0 : index
    %c0_4 = arith.constant 0 : index
    %3 = vector.load %arg3[%c0_3, %c0_4] : memref<1x32xf32, #tpu.memory_space<vmem>>, vector<1x32xf32>
    %4 = vector.broadcast %3 : vector<1x32xf32> to vector<8x32xf32>
    %5 = arith.addf %2, %4 : vector<8x32xf32>
    %6 = math.tanh %5 : vector<8x32xf32>
    %c0_5 = arith.constant 0 : index
    %c0_6 = arith.constant 0 : index
    %7 = vector.load %arg4[%c0_5, %c0_6] : memref<32x1xf32, #tpu.memory_space<vmem>>, vector<32x1xf32>
    %cst_7 = arith.constant dense<0.000000e+00> : vector<8x1xf32>
    %8 = tpu.matmul %6, %7, %cst_7 {dimension_numbers = #tpu.dot_dimension_numbers<[1], [0], [0], [1], [0, 0, 1, 1], [], []>} : vector<8x32xf32>, vector<32x1xf32>, vector<8x1xf32> -> vector<8x1xf32>
    %c0_8 = arith.constant 0 : index
    %c0_9 = arith.constant 0 : index
    %9 = memref.load %arg5[%c0_8, %c0_9] : memref<1x1xf32, #tpu.memory_space<smem>>
    %10 = vector.broadcast %9 : f32 to vector<8x1xf32>
    %11 = arith.addf %8, %10 : vector<8x1xf32>
    %12 = math.tanh %11 : vector<8x1xf32>
    %c0_10 = arith.constant 0 : index
    %c0_11 = arith.constant 0 : index
    %13 = vector.load %arg6[%c0_10, %c0_11] : memref<8x1xf32, #tpu.memory_space<vmem>>, vector<8x1xf32>
    tpu.vector_store %arg6[%c0_10, %c0_11], %12 {strides = array<i32>} : memref<8x1xf32, #tpu.memory_space<vmem>>, vector<8x1xf32>,
    return
  }
  func.func @transform_0(%arg0: i32) -> (i32, i32) {
    %c0_i32 = arith.constant 0 : i32
    %c0_i32_0 = arith.constant 0 : i32
    return %arg0, %c0_i32 : i32, i32
  }
  func.func @transform_1(%arg0: i32) -> (i32, i32) {
    %c0_i32 = arith.constant 0 : i32
    %c0_i32_0 = arith.constant 0 : i32
    %c0_i32_1 = arith.constant 0 : i32
    return %c0_i32, %c0_i32_0 : i32, i32
  }
  func.func @transform_2(%arg0: i32) -> (i32, i32) {
    %c0_i32 = arith.constant 0 : i32
    %c0_i32_0 = arith.constant 0 : i32
    %c0_i32_1 = arith.constant 0 : i32
    return %c0_i32, %c0_i32_0 : i32, i32
  }
  func.func @transform_3(%arg0: i32) -> (i32, i32) {
    %c0_i32 = arith.constant 0 : i32
    %c0_i32_0 = arith.constant 0 : i32
    %c0_i32_1 = arith.constant 0 : i32
    return %c0_i32, %c0_i32_0 : i32, i32
  }
  func.func @transform_4(%arg0: i32) -> (i32, i32) {
    %c0_i32 = arith.constant 0 : i32
    %c0_i32_0 = arith.constant 0 : i32
    %c0_i32_1 = arith.constant 0 : i32
    return %c0_i32, %c0_i32_0 : i32, i32
  }
  func.func @transform_5(%arg0: i32) -> (i32, i32) {
    %c0_i32 = arith.constant 0 : i32
    %c0_i32_0 = arith.constant 0 : i32
    return %arg0, %c0_i32 : i32, i32
  }
}

</mosaic_0001>

<bundles_post_ra>
// kernel: simple_tc_model_dnn_forward.3
= control target key start
LH: loop header
LB: loop body
LE: loop exit
PB: predicated region body
PF: predicated region fallthrough
CT: control target
= control target key end

     0   :  { %s544_s20 = smov 0   ;;  %s597_s0 = inlined_call_operand.vmem [shape: f32[10,32], index: 0, kind: input, shape index: {}]   ;;  %s598_s1 = inlined_call_operand.vmem [shape: f32[32,32], index: 1, kind: input, shape index: {}]   ;;  %s599_s2 = inlined_call_operand.vmem [shape: f32[1,32], index: 2, kind: input, shape index: {}]   ;;  %s600_s3 = inlined_call_operand.vmem [shape: f32[32,1], index: 3, kind: input, shape index: {}]   ;;  %s601_s4 = inlined_call_operand.<no memory space> [shape: f32[1,1], index: 4, kind: input, shape index: {}]   ;;  %s602_s5 = inlined_call_operand.vmem [shape: f32[10,1], index: 5, kind: output, shape index: {}]  }
   0x1   :  { %10 = sst [smem:[#allocation2]] %s601_s4 }
   0x2 LB: > { %s443_s21 = sadd.s32 4294967295, %s507_s20   ;;  %p447_p0 = scmp.ge.s32.totalorder %s507_s20, 1  ;;  %s507_s20 = sphi %s544_s20, %s16_s20  }
   0x3   : > { %p187_p1 = scmp.lt.s32.totalorder %s507_s20, 3 }
   0x5   : > { %p188_p2 = pnand %p447_p0, %p187_p1 }
   0x6   : > { %p213_p3 = scmp.lt.s32.totalorder (!%p188_p2), %s443_s21, 1  ;;  %s312_s18 = sld [smem:[#allocation2]] (!%p188_p2) }
   0x7   : > { %191 = sbr.rel (%p188_p2) target bundleno = 440 (0x1b8), region = 40 }
   0xc   : > { %v225_v0 = vld [vmem:[%s598_s1 + $0x18] sm:$0xff]  ;;  %v509_v1 = vmov 0.0   ;;  %v224_v2 = vld [vmem:[%s598_s1 + $0x10] sm:$0xff]  ;;  %vm510_vm0 = vmmov 0   ;;  %s604_s21 = smov (!%p213_p3, %s443_s21), 1  ;;  %v223_v3 = vld [vmem:[%s598_s1 + $0x8] sm:$0xff]  ;;  %v313_v15 = vstv %s312_s18 }
   0xd   : > { %465 = vmatprep.subr.mxu0 %v509_v1  ;;  %473 = vmatprep.mubr.msk.f32.mxu0 %vm510_vm0, %v509_v1  ;;  %s448_s27 = sshll.u32 %s604_s21, 3  ;;  %v222_v4 = vld [vmem:[%s598_s1] sm:$0xff]  ;;  %vm233_vm1 = vcmask 261120   ;;  %v311_v6 = vld [vmem:[%s600_s3 + $0x18] sm:$0xff]  ;;  %v310_v7 = vld [vmem:[%s600_s3 + $0x10] sm:$0xff]  ;;  %vm388_vm2 = vcmask 7168  }
   0xe   : > { %466 = vmatpush3.msra.mxu0 %v225_v0  ;;  %476 = vmatprep.subr.mxu1 %v509_v1  ;;  %s216_s7 = scalar_lea.vmem %s597_s0, %s448_s27  ;;  %v309_v8 = vld [vmem:[%s600_s3 + $0x8] sm:$0xff]  ;;  %v308_v9 = vld [vmem:[%s600_s3] sm:$0xff]  ;;  %s220_s23 = scalar_lea.vmem %s602_s5, %s448_s27 }
   0xf   : > { %467 = vmatprep.subr.mxu0 %v509_v1  ;;  %484 = vmatprep.mubr.msk.f32.mxu1 %vm510_vm0, %v509_v1  ;;  %v221_v5 = vld [vmem:[%s216_s7] sm:$0xff] }
  0x10   : > { %468 = vmatpush3.msra.mxu0 %v224_v2  ;;  %477 = vmatpush3.msra.mxu1 %v311_v6  ;;  %v450_v10 = vld [vmem:[%s599_s2] ss:$0 sm:$0xff] }
  0x11   : > { %469 = vmatprep.subr.mxu0 %v509_v1  ;;  %478 = vmatprep.subr.mxu1 %v509_v1 }
  0x12   : > { %470 = vmatpush3.msra.mxu0 %v223_v3  ;;  %479 = vmatpush3.msra.mxu1 %v310_v7 }
  0x13   : > { %471 = vmatprep.subr.mxu0 %v509_v1  ;;  %480 = vmatprep.subr.mxu1 %v509_v1 }
  0x14   : > { %472 = vmatpush3.msra.mxu0 %v222_v4  ;;  %481 = vmatpush3.msra.mxu1 %v309_v8 }
  0x15   : > { %474 = vmatmul.mubr.msk.f32.vlgmr.msra.gmra.mxu0 %vm233_vm1, %v221_v5  ;;  %482 = vmatprep.subr.mxu1 %v509_v1 }
  0x16   : > { %483 = vmatpush3.msra.mxu1 %v308_v9 }
  0xd5   : > { %v303_v11 = vpop.f32.mrf.mxu0 }
  0xd6   : > { %v304_v12 = vadd.f32 %v450_v10, %v303_v11 }
  0xd7   : > { %v475_v13 = vpop.f32.mrf.mxu0 }
  0xd8   : > { %497 = vtanh.f32 %v304_v12 }
  0xe5   : > { %v498_v14 = vpop.eup %497 }
  0xe6   : > { %485 = vmatmul.mubr.msk.f32.vlgmr.msra.gmra.mxu1 %vm233_vm1, %v498_v14 }
 0x1a6   : > { %v383_v16 = vpop.f32.mrf.mxu1 }
 0x1a7   : > { %v384_v17 = vadd.f32 %v383_v16, %v313_v15 }
 0x1a8   : > { %v486_v18 = vpop.f32.mrf.mxu1 }
 0x1a9   : > { %499 = vtanh.f32 %v384_v17 }
 0x1b6   : > { %v500_v19 = vpop.eup %499 }
 0x1b7   : > { %389 = vst.msk [vmem:[%s220_s23] sm:$0xff] %vm388_vm2, %v500_v19 }
 0x1b8 PF: > { %s16_s20 = sadd.s32 1, %s507_s20  }
 0x1b9   : > { %p13_p4 = scmp.ge.s32.totalorder %s16_s20, 4  }
 0x1bb   :  { %15 = sbr.rel (!%p13_p4) target bundleno = 2 (0x2), region = 70 }

// kernel: simple_tc_model_dnn_forward.2
= control target key start
LH: loop header
LB: loop body
LE: loop exit
PB: predicated region body
PF: predicated region fallthrough
CT: control target
= control target key end

     0   :  { %v322_v0 = vmov 0.0   ;;  %vm323_vm0 = vmmov 0   ;;  %vm205_vm1 = vcmask 25600   ;;  %s496_s1 = inlined_call_operand.vmem [shape: f32[128,128], index: 1, kind: input, shape index: {}]   ;;  %s497_s3 = inlined_call_operand.vmem [shape: f32[128,4], index: 3, kind: input, shape index: {}]   ;;  %s498_s0 = inlined_call_operand.vmem [shape: f32[2,128], index: 0, kind: input, shape index: {}]   ;;  %s499_s2 = inlined_call_operand.vmem [shape: f32[1,128], index: 2, kind: input, shape index: {}]   ;;  %s500_s4 = inlined_call_operand.<no memory space> [shape: f32[1,1], index: 4, kind: input, shape index: {}]   ;;  %s501_s5 = inlined_call_operand.vmem [shape: f32[2,4], index: 5, kind: output, shape index: {}]  }
   0x1   :  { %246 = vmatprep.subr.mxu0 %v322_v0  ;;  %v37_v1 = vld [vmem:[%s496_s1 + $0x78] sm:$0xff]  ;;  %v36_v2 = vld [vmem:[%s496_s1 + $0x70] sm:$0xff]  ;;  %278 = vmatprep.mubr.msk.f32.mxu0 %vm323_vm0, %v322_v0  ;;  %v35_v3 = vld [vmem:[%s496_s1 + $0x68] sm:$0xff]  ;;  %v133_v39 = vstv %s500_s4 }
   0x2   :  { %247 = vmatpush3.msra.mxu0 %v37_v1  ;;  %281 = vmatprep.subr.mxu1 %v322_v0  ;;  %v34_v4 = vld [vmem:[%s496_s1 + $0x60] sm:$0xff]  ;;  %v131_v5 = vld [vmem:[%s497_s3 + $0x78] sm:$0xff]  ;;  %v130_v7 = vld [vmem:[%s497_s3 + $0x70] sm:$0xff] }
   0x3   :  { %248 = vmatprep.subr.mxu0 %v322_v0  ;;  %313 = vmatprep.mubr.msk.f32.mxu1 %vm323_vm0, %v322_v0  ;;  %v33_v6 = vld [vmem:[%s496_s1 + $0x58] sm:$0xff]  ;;  %v129_v8 = vld [vmem:[%s497_s3 + $0x68] sm:$0xff]  ;;  %v32_v9 = vld [vmem:[%s496_s1 + $0x50] sm:$0xff] }
   0x4   :  { %249 = vmatpush3.msra.mxu0 %v36_v2  ;;  %282 = vmatpush3.msra.mxu1 %v131_v5  ;;  %v128_v10 = vld [vmem:[%s497_s3 + $0x60] sm:$0xff]  ;;  %v31_v11 = vld [vmem:[%s496_s1 + $0x48] sm:$0xff]  ;;  %v127_v12 = vld [vmem:[%s497_s3 + $0x58] sm:$0xff] }
   0x5   :  { %250 = vmatprep.subr.mxu0 %v322_v0  ;;  %283 = vmatprep.subr.mxu1 %v322_v0  ;;  %v30_v13 = vld [vmem:[%s496_s1 + $0x40] sm:$0xff]  ;;  %v126_v14 = vld [vmem:[%s497_s3 + $0x50] sm:$0xff]  ;;  %v29_v15 = vld [vmem:[%s496_s1 + $0x38] sm:$0xff] }
   0x6   :  { %251 = vmatpush3.msra.mxu0 %v35_v3  ;;  %284 = vmatpush3.msra.mxu1 %v130_v7  ;;  %v125_v16 = vld [vmem:[%s497_s3 + $0x48] sm:$0xff]  ;;  %v28_v17 = vld [vmem:[%s496_s1 + $0x30] sm:$0xff]  ;;  %v26_v19 = vld [vmem:[%s496_s1 + $0x20] sm:$0xff] }
   0x7   :  { %252 = vmatprep.subr.mxu0 %v322_v0  ;;  %285 = vmatprep.subr.mxu1 %v322_v0  ;;  %v27_v18 = vld [vmem:[%s496_s1 + $0x28] sm:$0xff]  ;;  %v25_v20 = vld [vmem:[%s496_s1 + $0x18] sm:$0xff]  ;;  %v24_v21 = vld [vmem:[%s496_s1 + $0x10] sm:$0xff] }
   0x8   :  { %253 = vmatpush3.msra.mxu0 %v34_v4  ;;  %286 = vmatpush3.msra.mxu1 %v129_v8  ;;  %v23_v22 = vld [vmem:[%s496_s1 + $0x8] sm:$0xff]  ;;  %v22_v23 = vld [vmem:[%s496_s1] sm:$0xff]  ;;  %v123_v26 = vld [vmem:[%s497_s3 + $0x38] sm:$0xff] }
   0x9   :  { %254 = vmatprep.subr.mxu0 %v322_v0  ;;  %287 = vmatprep.subr.mxu1 %v322_v0  ;;  %v21_v24 = vld [vmem:[%s498_s0] sm:$0x3]  ;;  %v122_v27 = vld [vmem:[%s497_s3 + $0x30] sm:$0xff]  ;;  %v121_v28 = vld [vmem:[%s497_s3 + $0x28] sm:$0xff] }
   0xa   :  { %255 = vmatpush3.msra.mxu0 %v33_v6  ;;  %288 = vmatpush3.msra.mxu1 %v128_v10  ;;  %v124_v25 = vld [vmem:[%s497_s3 + $0x40] sm:$0xff]  ;;  %v119_v30 = vld [vmem:[%s497_s3 + $0x18] sm:$0xff]  ;;  %v118_v31 = vld [vmem:[%s497_s3 + $0x10] sm:$0xff] }
   0xb   :  { %256 = vmatprep.subr.mxu0 %v322_v0  ;;  %289 = vmatprep.subr.mxu1 %v322_v0  ;;  %v120_v29 = vld [vmem:[%s497_s3 + $0x20] sm:$0xff]  ;;  %v117_v32 = vld [vmem:[%s497_s3 + $0x8] sm:$0xff] }
   0xc   :  { %257 = vmatpush3.msra.mxu0 %v32_v9  ;;  %290 = vmatpush3.msra.mxu1 %v127_v12  ;;  %v116_v33 = vld [vmem:[%s497_s3] sm:$0xff] }
   0xd   :  { %258 = vmatprep.subr.mxu0 %v322_v0  ;;  %291 = vmatprep.subr.mxu1 %v322_v0  ;;  %v211_v34 = vld [vmem:[%s499_s2] ss:$0 sm:$0xff] }
   0xe   :  { %259 = vmatpush3.msra.mxu0 %v31_v11  ;;  %292 = vmatpush3.msra.mxu1 %v126_v14 }
   0xf   :  { %260 = vmatprep.subr.mxu0 %v322_v0  ;;  %293 = vmatprep.subr.mxu1 %v322_v0 }
  0x10   :  { %261 = vmatpush3.msra.mxu0 %v30_v13  ;;  %294 = vmatpush3.msra.mxu1 %v125_v16 }
  0x11   :  { %262 = vmatprep.subr.mxu0 %v322_v0  ;;  %295 = vmatprep.subr.mxu1 %v322_v0 }
  0x12   :  { %263 = vmatpush3.msra.mxu0 %v29_v15  ;;  %296 = vmatpush3.msra.mxu1 %v124_v25 }
  0x13   :  { %264 = vmatprep.subr.mxu0 %v322_v0  ;;  %297 = vmatprep.subr.mxu1 %v322_v0 }
  0x14   :  { %265 = vmatpush3.msra.mxu0 %v28_v17  ;;  %298 = vmatpush3.msra.mxu1 %v123_v26 }
  0x15   :  { %266 = vmatprep.subr.mxu0 %v322_v0  ;;  %299 = vmatprep.subr.mxu1 %v322_v0 }
  0x16   :  { %267 = vmatpush3.msra.mxu0 %v27_v18  ;;  %300 = vmatpush3.msra.mxu1 %v122_v27 }
  0x17   :  { %268 = vmatprep.subr.mxu0 %v322_v0  ;;  %301 = vmatprep.subr.mxu1 %v322_v0 }
  0x18   :  { %269 = vmatpush3.msra.mxu0 %v26_v19  ;;  %302 = vmatpush3.msra.mxu1 %v121_v28 }
  0x19   :  { %270 = vmatprep.subr.mxu0 %v322_v0  ;;  %303 = vmatprep.subr.mxu1 %v322_v0 }
  0x1a   :  { %271 = vmatpush3.msra.mxu0 %v25_v20  ;;  %304 = vmatpush3.msra.mxu1 %v120_v29 }
  0x1b   :  { %272 = vmatprep.subr.mxu0 %v322_v0  ;;  %305 = vmatprep.subr.mxu1 %v322_v0 }
  0x1c   :  { %273 = vmatpush3.msra.mxu0 %v24_v21  ;;  %306 = vmatpush3.msra.mxu1 %v119_v30 }
  0x1d   :  { %274 = vmatprep.subr.mxu0 %v322_v0  ;;  %307 = vmatprep.subr.mxu1 %v322_v0 }
  0x1e   :  { %275 = vmatpush3.msra.mxu0 %v23_v22  ;;  %308 = vmatpush3.msra.mxu1 %v118_v31 }
  0x1f   :  { %276 = vmatprep.subr.mxu0 %v322_v0  ;;  %309 = vmatprep.subr.mxu1 %v322_v0 }
  0x20   :  { %277 = vmatpush3.msra.mxu0 %v22_v23  ;;  %310 = vmatpush3.msra.mxu1 %v117_v32 }
  0x21   :  { %279 = vmatmul.mubr.f32.vlgmr.msra.gmra.mxu0 %v21_v24  ;;  %311 = vmatprep.subr.mxu1 %v322_v0 }
  0x22   :  { %312 = vmatpush3.msra.mxu1 %v116_v33 }
  0xe1   :  { %v111_v35 = vpop.f32.mrf.mxu0 }
  0xe2   :  { %v112_v36 = vadd.f32 %v211_v34, %v111_v35 }
  0xe3   :  { %v280_v37 = vpop.f32.mrf.mxu0 }
  0xe4   :  { %318 = vtanh.f32 %v112_v36 }
  0xf1   :  { %v319_v38 = vpop.eup %318 }
  0xf2   :  { %314 = vmatmul.mubr.f32.vlgmr.msra.gmra.mxu1 %v319_v38 }
 0x1b2   :  { %v200_v40 = vpop.f32.mrf.mxu1 }
 0x1b3   :  { %v201_v41 = vadd.f32 %v200_v40, %v133_v39 }
 0x1b4   :  { %v315_v42 = vpop.f32.mrf.mxu1 }
 0x1b5   :  { %320 = vtanh.f32 %v201_v41 }
 0x1c2   :  { %v321_v43 = vpop.eup %320 }
 0x1c3   :  { %206 = vst.msk [vmem:[%s501_s5] sm:$0x3] %vm205_vm1, %v321_v43 }

</bundles_post_ra>
